<compile_context>
chip_gen: v7x
topology: tpu7x:2x2x1
jax: 0.10.0
libtpu: 0.0.40
codegen_flags: <defaults>
</compile_context>

<pallas_src>
import jax
import jax.numpy as jnp
from jax.experimental import pallas as pl
from jax.experimental.pallas import tpu as pltpu

_LANE = 128


# ----------------------------------------------------------------------------
# Small helpers
# ----------------------------------------------------------------------------
def _round_up(x, m):
    return (x + m - 1) // m * m


def _pad2(a, rows, cols):
    return jnp.pad(a, ((0, rows - a.shape[0]), (0, cols - a.shape[1])))


def _vmem_capacity_bytes():
    try:
        return int(pltpu.get_tpu_info().vmem_capacity_bytes)
    except Exception:
        return 64 * 1024 * 1024          # conservative (v7x per-core) default


def _vmem_limit(footprint_bytes):
    """Footprint-derived scoped-VMEM limit (not a flat 48 MiB)."""
    return min(2 * int(footprint_bytes) + (8 << 20), 64 << 20)


# Measured HBM-roofline efficiencies per agg tile size; cost model is
# padded_elements / efficiency (so awkward N never falls back to 128 tiles
# unless that is genuinely cheapest).
_TILE_EFF = ((1024, 0.86), (512, 0.85), (256, 0.63), (128, 0.29))


def _pick_tile(n):
    best = None
    for t, eff in _TILE_EFF:             # largest first; ties go to larger tile
        n_pad = _round_up(n, t)
        cost = (n_pad * n_pad) / eff
        if best is None or cost < best[2]:
            best = (t, n_pad, cost)
    return best[0], best[1]


def _fused_path_fits(n_pad, h_p, o_p):
    """Can both layers run in one kernel with agg fully VMEM-resident?"""
    budget = int(0.45 * _vmem_capacity_bytes())
    need = (2 * n_pad * n_pad * 2          # bf16 agg, x2 buffering
            + n_pad * (h_p + o_p) * 10     # activations / in-kernel temps
            + (4 << 20))
    return need <= budget


# ----------------------------------------------------------------------------
# Kernels
# ----------------------------------------------------------------------------
def gcn_agg_layer_kernel(agg_ref, xw_ref, s_ref, b_ref, o_ref, acc_ref):
    """One grid step of   out = relu((agg_int8 * row_scale) @ xw + b).

    agg_ref : (tm, tk) int8 tile of the row-quantized aggregation matrix.
    xw_ref  : (n_pad, fout_p) bf16, VMEM-resident (constant index_map), the
              precomputed feature transform x @ W.
    s_ref   : (tm, 1) f32 per-row dequantization scales.
    """
    k = pl.program_id(1)
    nk = pl.num_programs(1)
    tk = agg_ref.shape[1]

    @pl.when(k == 0)
    def _init():
        acc_ref[...] = jnp.zeros_like(acc_ref)

    # int8 -> bf16 on the VPU (which has slack in this HBM-bound regime); the
    # integer values (|q| <= 127) are exactly representable in bf16.
    a_tile = agg_ref[...].astype(jnp.float32).astype(jnp.bfloat16)
    off = pl.multiple_of(k * tk, tk)
    xw_tile = xw_ref[pl.ds(off, tk), :]
    acc_ref[...] += jnp.dot(a_tile, xw_tile, preferred_element_type=jnp.float32)

    @pl.when(k == nk - 1)
    def _finalize():
        o_ref[...] = jnp.maximum(acc_ref[...] * s_ref[...] + b_ref[...],
                                 0.0).astype(o_ref.dtype)


def gcn_fused_kernel(agg_ref, xw1_ref, w2_ref, b1_ref, b2_ref, o_ref):
    """Both GCN layers with agg fully VMEM-resident (single HBM read of agg)."""
    agg = agg_ref[...]                                           # (n_pad, n_pad) bf16
    h = jnp.maximum(
        jnp.dot(agg, xw1_ref[...], preferred_element_type=jnp.float32)
        + b1_ref[...], 0.0).astype(jnp.bfloat16)
    hw2 = jnp.dot(h, w2_ref[...],
                  preferred_element_type=jnp.float32).astype(jnp.bfloat16)
    z = jnp.dot(agg, hw2, preferred_element_type=jnp.float32) + b2_ref[...]
    o_ref[...] = jnp.maximum(z, 0.0).astype(o_ref.dtype)


# ----------------------------------------------------------------------------
# pallas_call wrappers
# ----------------------------------------------------------------------------
def _gcn_agg_layer(agg_q, xw, row_scale, b, tile, out_dtype):
    """Streaming path: out = relu(dequant(agg_q) @ xw + b), agg tiled over a grid."""
    n_pad = agg_q.shape[0]
    fout_p = xw.shape[1]
    tm = tk = tile
    grid = (n_pad // tm, n_pad // tk)

    out_bytes = jnp.dtype(out_dtype).itemsize
    flops = 2 * n_pad * n_pad * fout_p
    bytes_accessed = (n_pad * n_pad              # int8 agg streamed once
                      + n_pad * fout_p * 2       # resident xw, read once
                      + n_pad * 4 + fout_p * 4
                      + n_pad * fout_p * out_bytes)

    footprint = (2 * tm * tk                     # agg int8 tile, x2 buffers
                 + tm * tk * 6                   # in-kernel f32 + bf16 dequant temps
                 + 2 * n_pad * fout_p * 2        # resident xw
                 + 2 * tm * fout_p * out_bytes   # output tile, x2 buffers
                 + tm * fout_p * 4               # f32 accumulator scratch
                 + 2 * (tm + fout_p) * 4)        # row scales + bias

    return pl.pallas_call(
        gcn_agg_layer_kernel,
        out_shape=jax.ShapeDtypeStruct((n_pad, fout_p), out_dtype),
        grid_spec=pltpu.PrefetchScalarGridSpec(
            num_scalar_prefetch=0,
            grid=grid,
            in_specs=[
                pl.BlockSpec((tm, tk), lambda i, k: (i, k)),         # agg tile (streamed)
                pl.BlockSpec((n_pad, fout_p), lambda i, k: (0, 0)),  # xw (VMEM-resident)
                pl.BlockSpec((tm, 1), lambda i, k: (i, 0)),          # per-row dequant scale
                pl.BlockSpec((1, fout_p), lambda i, k: (0, 0)),      # bias (resident)
            ],
            out_specs=pl.BlockSpec((tm, fout_p), lambda i, k: (i, 0)),
            scratch_shapes=[pltpu.VMEM((tm, fout_p), jnp.float32)],
        ),
        compiler_params=pltpu.CompilerParams(
            dimension_semantics=("parallel", "arbitrary"),
            vmem_limit_bytes=_vmem_limit(footprint),
        ),
        cost_estimate=pl.CostEstimate(
            flops=int(flops), transcendentals=0,
            bytes_accessed=int(bytes_accessed)),
    )(agg_q, xw, row_scale, b)


def _gcn_fused(agg_bf, xw1, w2, b1, b2):
    """Fused path: both layers in one kernel, agg read from HBM exactly once."""
    n_pad = agg_bf.shape[0]
    h_p = xw1.shape[1]
    o_p = w2.shape[1]

    flops = 2 * n_pad * n_pad * (h_p + o_p) + 2 * n_pad * h_p * o_p
    bytes_accessed = (n_pad * n_pad * 2 + n_pad * h_p * 2 + h_p * o_p * 2
                      + (h_p + o_p) * 4 + n_pad * o_p * 4)
    footprint = (2 * n_pad * n_pad * 2           # bf16 agg, x2 buffers
                 + 2 * n_pad * h_p * 2           # xw1
                 + n_pad * (h_p + o_p) * 8       # in-kernel h / hw2 / z temporaries
                 + 2 * n_pad * o_p * 4           # output
                 + 2 * (h_p * o_p * 2 + (h_p + o_p) * 4))

    return pl.pallas_call(
        gcn_fused_kernel,
        out_shape=jax.ShapeDtypeStruct((n_pad, o_p), jnp.float32),
        grid_spec=pltpu.PrefetchScalarGridSpec(
            num_scalar_prefetch=0,
            grid=(1,),
            in_specs=[
                pl.BlockSpec((n_pad, n_pad), lambda i: (0, 0)),
                pl.BlockSpec((n_pad, h_p), lambda i: (0, 0)),
                pl.BlockSpec((h_p, o_p), lambda i: (0, 0)),
                pl.BlockSpec((1, h_p), lambda i: (0, 0)),
                pl.BlockSpec((1, o_p), lambda i: (0, 0)),
            ],
            out_specs=pl.BlockSpec((n_pad, o_p), lambda i: (0, 0)),
        ),
        compiler_params=pltpu.CompilerParams(
            dimension_semantics=("arbitrary",),
            vmem_limit_bytes=_vmem_limit(footprint),
        ),
        cost_estimate=pl.CostEstimate(
            flops=int(flops), transcendentals=0,
            bytes_accessed=int(bytes_accessed)),
    )(agg_bf, xw1, w2, b1, b2)


# ----------------------------------------------------------------------------
# Full forward pass
# ----------------------------------------------------------------------------
def _build_agg(adj_matrix, n):
    """Dense normalized GCN aggregation matrix, built already transposed in one
    fused elementwise pass: agg[j, i] = dinv[j] * (triu(A,1)+I)[i, j] * dinv[i]."""
    adj_t = adj_matrix.astype(jnp.float32).T
    a_hat_t = jnp.tril(adj_t, k=-1) + jnp.eye(n, dtype=jnp.float32)
    deg = jnp.sum(a_hat_t, axis=1)                  # in-degree by target node
    dinv = jnp.where(deg > 0, jax.lax.rsqrt(deg), 0.0)
    return dinv[:, None] * a_hat_t * dinv[None, :]


def gcn_forward(x, adj_matrix, w1, b1, w2, b2, *, force_tiled=False, tile=None):
    n, _ = x.shape
    hid = w1.shape[1]
    out_dim = w2.shape[1]
    h_p = _round_up(hid, _LANE)
    o_p = _round_up(out_dim, _LANE)

    agg = _build_agg(adj_matrix, n)                 # (n, n) f32

    x_f = x.astype(jnp.float32)
    w1_f = w1.astype(jnp.float32)
    w2_pf = _pad2(w2.astype(jnp.float32), h_p, o_p)
    b1_p = _pad2(b1.reshape(1, -1).astype(jnp.float32), 1, h_p)
    b2_p = _pad2(b2.reshape(1, -1).astype(jnp.float32), 1, o_p)

    n_pad128 = _round_up(n, _LANE)
    if (not force_tiled) and _fused_path_fits(n_pad128, h_p, o_p):
        # -------- small/medium graph: one kernel, agg read from HBM once. ----
        n_pad = n_pad128
        agg_bf = _pad2(agg.astype(jnp.bfloat16), n_pad, n_pad)     # cast early, pad int8/bf16
        xw1 = _pad2(x_f @ w1_f, n_pad, h_p).astype(jnp.bfloat16)   # hoisted feature transform
        z = _gcn_fused(agg_bf, xw1, w2_pf.astype(jnp.bfloat16), b1_p, b2_p)
    else:
        # -------- large graph: stream int8-quantized agg tiles over a grid. --
        if tile is None:
            tile, n_pad = _pick_tile(n)
        else:
            n_pad = _round_up(n, tile)

        # Per-row symmetric int8 quantization (halves the dominant HBM stream);
        # per-row scales keep accuracy for graphs with heterogeneous degrees.
        row_max = jnp.maximum(jnp.max(jnp.abs(agg), axis=1, keepdims=True), 1e-12)
        agg_q = _pad2(
            jnp.clip(jnp.round(agg * (127.0 / row_max)), -127, 127).astype(jnp.int8),
            n_pad, n_pad)
        row_scale = _pad2(row_max * (1.0 / 127.0), n_pad, 1)       # dequant factors

        # Feature transforms hoisted out of the kernel k-loop (VMEM-resident).
        xw1 = _pad2(x_f @ w1_f, n_pad, h_p).astype(jnp.bfloat16)
        h = _gcn_agg_layer(agg_q, xw1, row_scale, b1_p, tile, jnp.bfloat16)
        hw2 = (h.astype(jnp.float32) @ w2_pf).astype(jnp.bfloat16)
        z = _gcn_agg_layer(agg_q, hw2, row_scale, b2_p, tile, jnp.float32)

    # softmax over the node axis + transpose: O(N * out_dim) wrapper glue, keeps
    # the kernel outputs lane-dense and avoids a cross-row-tile reduction.
    logits = z[:n, :out_dim]
    return jax.nn.softmax(logits, axis=0).T                        # (output_dim, N)


def reference_forward(x, adj_matrix, w1, b1, w2, b2):
    """Pure f32 JAX reference with identical semantics."""
    n = x.shape[0]
    a = jnp.triu(adj_matrix.astype(jnp.float32), k=1)
    a_hat = a + jnp.eye(n, dtype=jnp.float32)
    deg = jnp.sum(a_hat, axis=0)
    dinv = jnp.where(deg > 0, 1.0 / jnp.sqrt(deg), 0.0)
    agg = (dinv[:, None] * a_hat * dinv[None, :]).T
    h = jnp.maximum(agg @ (x @ w1) + b1, 0.0)
    h2 = jnp.maximum(agg @ (h @ w2) + b2, 0.0)
    return jax.nn.softmax(h2, axis=0).T


if __name__ == "__main__":
    N = 16
    INPUT_DIM = 8
    HIDDEN_DIM = 32
    OUTPUT_DIM = 4

    key = jax.random.PRNGKey(0)
    k_x, k_adj, k_w1, k_w2, k_x2, k_adj2 = jax.random.split(key, 6)

    def glorot(k, fan_in, fan_out):
        lim = jnp.sqrt(6.0 / (fan_in + fan_out))
        return jax.random.uniform(k, (fan_in, fan_out), jnp.float32, -lim, lim)

    x = jax.random.normal(k_x, (N, INPUT_DIM), dtype=jnp.float32)
    raw = jax.random.uniform(k_adj, (N, N), dtype=jnp.float32)
    adj_matrix = jnp.where(raw > 0.6, raw, 0.0)          # weighted edges

    w1 = glorot(k_w1, INPUT_DIM, HIDDEN_DIM)
    b1 = jnp.zeros((1, HIDDEN_DIM), jnp.float32)
    w2 = glorot(k_w2, HIDDEN_DIM, OUTPUT_DIM)
    b2 = jnp.zeros((1, OUTPUT_DIM), jnp.float32)

    fwd = jax.jit(gcn_forward, static_argnames=("force_tiled", "tile"))

    # 1) Small graph -> fused path (agg fully VMEM-resident, read once).
    out = jax.block_until_ready(fwd(x, adj_matrix, w1, b1, w2, b2))
    ref = reference_forward(x, adj_matrix, w1, b1, w2, b2)
    assert out.shape == (OUTPUT_DIM, N), out.shape
    assert jnp.allclose(out, ref, atol=1e-2, rtol=1e-2), "fused path mismatch"

    # 2) Larger graph, forced onto the streaming path with a small tile so the
    #    multi-tile grid / accumulator / resident-xw / int8-dequant code runs.
    N2 = 200
    x2 = jax.random.normal(k_x2, (N2, INPUT_DIM), dtype=jnp.float32)
    raw2 = jax.random.uniform(k_adj2, (N2, N2), dtype=jnp.float32)
    adj2 = jnp.where(raw2 > 0.6, raw2, 0.0)
    out2 = jax.block_until_ready(
        fwd(x2, adj2, w1, b1, w2, b2, force_tiled=True, tile=128))
    ref2 = reference_forward(x2, adj2, w1, b1, w2, b2)
    assert out2.shape == (OUTPUT_DIM, N2), out2.shape
    assert jnp.allclose(out2, ref2, atol=3e-3, rtol=3e-2), "tiled path mismatch"

    print("KERNEL_OK")
</pallas_src>

<mosaic_0001>
module attributes {stable_mosaic.version = 11 : i64} {
  func.func @gcn_fused_kernel(%arg0: i32, %arg1: memref<128x128xbf16, #tpu.memory_space<vmem>>, %arg2: memref<128x128xbf16, #tpu.memory_space<vmem>>, %arg3: memref<128x128xbf16, #tpu.memory_space<vmem>>, %arg4: memref<1x128xf32, #tpu.memory_space<vmem>>, %arg5: memref<1x128xf32, #tpu.memory_space<vmem>>, %arg6: memref<128x128xf32, #tpu.memory_space<vmem>>) attributes {dimension_semantics = [#tpu.dimension_semantics<arbitrary>], iteration_bounds = array<i64: 1>, scalar_prefetch = 0 : i64, scratch_operands = 0 : i64, tpu.core_type = #tpu.core_type<tc>, window_params = [{pipeline_mode = #tpu.pipeline_mode<synchronous>, transform_indices = @transform_0, window_bounds = array<i64: 128, 128>}, {pipeline_mode = #tpu.pipeline_mode<synchronous>, transform_indices = @transform_1, window_bounds = array<i64: 128, 128>}, {pipeline_mode = #tpu.pipeline_mode<synchronous>, transform_indices = @transform_2, window_bounds = array<i64: 128, 128>}, {pipeline_mode = #tpu.pipeline_mode<synchronous>, transform_indices = @transform_3, window_bounds = array<i64: 1, 128>}, {pipeline_mode = #tpu.pipeline_mode<synchronous>, transform_indices = @transform_4, window_bounds = array<i64: 1, 128>}, {pipeline_mode = #tpu.pipeline_mode<synchronous>, transform_indices = @transform_5, window_bounds = array<i64: 128, 128>}]} {
    %c0 = arith.constant 0 : index
    %c0_0 = arith.constant 0 : index
    %0 = vector.load %arg1[%c0, %c0_0] : memref<128x128xbf16, #tpu.memory_space<vmem>>, vector<128x128xbf16>
    %c0_1 = arith.constant 0 : index
    %c0_2 = arith.constant 0 : index
    %1 = vector.load %arg2[%c0_1, %c0_2] : memref<128x128xbf16, #tpu.memory_space<vmem>>, vector<128x128xbf16>
    %cst = arith.constant dense<0.000000e+00> : vector<128x128xf32>
    %2 = tpu.matmul %0, %1, %cst {dimension_numbers = #tpu.dot_dimension_numbers<[1], [0], [0], [1], [0, 0, 1, 1], [], []>} : vector<128x128xbf16>, vector<128x128xbf16>, vector<128x128xf32> -> vector<128x128xf32>
    %c0_3 = arith.constant 0 : index
    %c0_4 = arith.constant 0 : index
    %3 = vector.load %arg4[%c0_3, %c0_4] : memref<1x128xf32, #tpu.memory_space<vmem>>, vector<1x128xf32>
    %4 = vector.broadcast %3 : vector<1x128xf32> to vector<128x128xf32>
    %5 = arith.addf %2, %4 : vector<128x128xf32>
    %cst_5 = arith.constant 0.000000e+00 : f32
    %6 = vector.broadcast %cst_5 : f32 to vector<128x128xf32>
    %7 = arith.maximumf %5, %6 : vector<128x128xf32>
    %8 = arith.truncf %7 : vector<128x128xf32> to vector<128x128xbf16>
    %c0_6 = arith.constant 0 : index
    %c0_7 = arith.constant 0 : index
    %9 = vector.load %arg3[%c0_6, %c0_7] : memref<128x128xbf16, #tpu.memory_space<vmem>>, vector<128x128xbf16>
    %cst_8 = arith.constant dense<0.000000e+00> : vector<128x128xf32>
    %10 = tpu.matmul %8, %9, %cst_8 {dimension_numbers = #tpu.dot_dimension_numbers<[1], [0], [0], [1], [0, 0, 1, 1], [], []>} : vector<128x128xbf16>, vector<128x128xbf16>, vector<128x128xf32> -> vector<128x128xf32>
    %11 = arith.truncf %10 : vector<128x128xf32> to vector<128x128xbf16>
    %cst_9 = arith.constant dense<0.000000e+00> : vector<128x128xf32>
    %12 = tpu.matmul %0, %11, %cst_9 {dimension_numbers = #tpu.dot_dimension_numbers<[1], [0], [0], [1], [0, 0, 1, 1], [], []>} : vector<128x128xbf16>, vector<128x128xbf16>, vector<128x128xf32> -> vector<128x128xf32>
    %c0_10 = arith.constant 0 : index
    %c0_11 = arith.constant 0 : index
    %13 = vector.load %arg5[%c0_10, %c0_11] : memref<1x128xf32, #tpu.memory_space<vmem>>, vector<1x128xf32>
    %14 = vector.broadcast %13 : vector<1x128xf32> to vector<128x128xf32>
    %15 = arith.addf %12, %14 : vector<128x128xf32>
    %cst_12 = arith.constant 0.000000e+00 : f32
    %16 = vector.broadcast %cst_12 : f32 to vector<128x128xf32>
    %17 = arith.maximumf %15, %16 : vector<128x128xf32>
    %c0_13 = arith.constant 0 : index
    %c0_14 = arith.constant 0 : index
    %18 = vector.load %arg6[%c0_13, %c0_14] : memref<128x128xf32, #tpu.memory_space<vmem>>, vector<128x128xf32>
    tpu.vector_store %arg6[%c0_13, %c0_14], %17 {strides = array<i32>} : memref<128x128xf32, #tpu.memory_space<vmem>>, vector<128x128xf32>,
    return
  }
  func.func @transform_0(%arg0: i32) -> (i32, i32) {
    %c0_i32 = arith.constant 0 : i32
    %c0_i32_0 = arith.constant 0 : i32
    %c0_i32_1 = arith.constant 0 : i32
    return %c0_i32, %c0_i32_0 : i32, i32
  }
  func.func @transform_1(%arg0: i32) -> (i32, i32) {
    %c0_i32 = arith.constant 0 : i32
    %c0_i32_0 = arith.constant 0 : i32
    %c0_i32_1 = arith.constant 0 : i32
    return %c0_i32, %c0_i32_0 : i32, i32
  }
  func.func @transform_2(%arg0: i32) -> (i32, i32) {
    %c0_i32 = arith.constant 0 : i32
    %c0_i32_0 = arith.constant 0 : i32
    %c0_i32_1 = arith.constant 0 : i32
    return %c0_i32, %c0_i32_0 : i32, i32
  }
  func.func @transform_3(%arg0: i32) -> (i32, i32) {
    %c0_i32 = arith.constant 0 : i32
    %c0_i32_0 = arith.constant 0 : i32
    %c0_i32_1 = arith.constant 0 : i32
    return %c0_i32, %c0_i32_0 : i32, i32
  }
  func.func @transform_4(%arg0: i32) -> (i32, i32) {
    %c0_i32 = arith.constant 0 : i32
    %c0_i32_0 = arith.constant 0 : i32
    %c0_i32_1 = arith.constant 0 : i32
    return %c0_i32, %c0_i32_0 : i32, i32
  }
  func.func @transform_5(%arg0: i32) -> (i32, i32) {
    %c0_i32 = arith.constant 0 : i32
    %c0_i32_0 = arith.constant 0 : i32
    %c0_i32_1 = arith.constant 0 : i32
    return %c0_i32, %c0_i32_0 : i32, i32
  }
}

</mosaic_0001>

<bundles_post_ra>
// kernel: gcn_forward.1
= control target key start
LH: loop header
LB: loop body
LE: loop exit
PB: predicated region body
PF: predicated region fallthrough
CT: control target
= control target key end

     0   :  { %s980_s1 = inlined_call_operand.vmem [shape: bf16[128,128], index: 1, kind: input, shape index: {}]   ;;  %s981_s0 = inlined_call_operand.vmem [shape: bf16[128,128], index: 0, kind: input, shape index: {}]   ;;  %s982_s2 = inlined_call_operand.vmem [shape: bf16[128,128], index: 2, kind: input, shape index: {}]   ;;  %s983_s3 = inlined_call_operand.vmem [shape: f32[1,128], index: 3, kind: input, shape index: {}]   ;;  %s984_s4 = inlined_call_operand.vmem [shape: f32[1,128], index: 4, kind: input, shape index: {}]   ;;  %s985_s5 = inlined_call_operand.vmem [shape: f32[128,128], index: 5, kind: output, shape index: {}]  }
   0x1   :  { %v772_v0 = vld [vmem:[%s980_s1] sm:$0xff]   ;;  %v773_v1 = vld [vmem:[%s980_s1 + $0x8] sm:$0xff]   ;;  %v774_v2 = vld [vmem:[%s980_s1 + $0x10] sm:$0xff]  }
   0x2   :  { %660 = vmatprep.subr.bf16.mxu0 %v772_v0  ;;  %v775_v3 = vld [vmem:[%s980_s1 + $0x18] sm:$0xff]   ;;  %v780_v4 = vld [vmem:[%s981_s0] sm:$0xff]   ;;  %v777_v6 = vld [vmem:[%s980_s1 + $0x28] sm:$0xff]  }
   0x3   :  { %661 = vmatpush3.bf16.msra.mxu0 %v772_v0  ;;  %676 = vmatprep.mubr.bf16.mxu0 %v780_v4  ;;  %v776_v5 = vld [vmem:[%s980_s1 + $0x20] sm:$0xff]   ;;  %v789_v8 = vld [vmem:[%s982_s2 + $0x8] sm:$0xff]   ;;  %v778_v9 = vld [vmem:[%s980_s1 + $0x30] sm:$0xff]  }
   0x4   :  { %662 = vmatprep.subr.bf16.mxu0 %v773_v1  ;;  %v788_v7 = vld [vmem:[%s982_s2] sm:$0xff]   ;;  %v790_v10 = vld [vmem:[%s982_s2 + $0x10] sm:$0xff]   ;;  %v779_v11 = vld [vmem:[%s980_s1 + $0x38] sm:$0xff]  }
   0x5   :  { %692 = vmatprep.subr.bf16.mxu1 %v788_v7  ;;  %v791_v12 = vld [vmem:[%s982_s2 + $0x18] sm:$0xff]   ;;  %v792_v13 = vld [vmem:[%s982_s2 + $0x20] sm:$0xff]   ;;  %v871_v14 = vld [vmem:[%s981_s0 + $0x8] sm:$0xff]  }
   0x6   :  { %693 = vmatpush3.bf16.msra.mxu1 %v788_v7  ;;  %v876_v15 = vld [vmem:[%s981_s0 + $0x10] sm:$0xff]   ;;  %v793_v16 = vld [vmem:[%s982_s2 + $0x28] sm:$0xff]   ;;  %v886_v17 = vld [vmem:[%s981_s0 + $0x18] sm:$0xff]  }
   0x7   :  { %663 = vmatpush3.bf16.msra.mxu0 %v773_v1  ;;  %694 = vmatprep.subr.bf16.mxu1 %v789_v8  ;;  %v891_v18 = vld [vmem:[%s981_s0 + $0x20] sm:$0xff]   ;;  %v898_v19 = vld [vmem:[%s981_s0 + $0x28] sm:$0xff]   ;;  %v903_v20 = vld [vmem:[%s981_s0 + $0x30] sm:$0xff]  }
   0x8   :  { %664 = vmatprep.subr.bf16.mxu0 %v774_v2  ;;  %v910_v21 = vld [vmem:[%s981_s0 + $0x38] sm:$0xff]   ;;  %v794_v22 = vld [vmem:[%s982_s2 + $0x30] sm:$0xff]   ;;  %v586_v24 = vld [vmem:[%s983_s3] ss:$0 sm:$0xff] }
   0x9   :  { %v795_v23 = vld [vmem:[%s982_s2 + $0x38] sm:$0xff]  }
   0xa   :  { %695 = vmatpush3.bf16.msra.mxu1 %v789_v8 }
   0xb   :  { %665 = vmatpush3.bf16.msra.mxu0 %v774_v2  ;;  %696 = vmatprep.subr.bf16.mxu1 %v790_v10 }
   0xc   :  { %666 = vmatprep.subr.bf16.mxu0 %v775_v3 }
   0xe   :  { %697 = vmatpush3.bf16.msra.mxu1 %v790_v10 }
   0xf   :  { %667 = vmatpush3.bf16.msra.mxu0 %v775_v3  ;;  %698 = vmatprep.subr.bf16.mxu1 %v791_v12 }
  0x10   :  { %668 = vmatprep.subr.bf16.mxu0 %v776_v5 }
  0x12   :  { %699 = vmatpush3.bf16.msra.mxu1 %v791_v12 }
  0x13   :  { %669 = vmatpush3.bf16.msra.mxu0 %v776_v5  ;;  %700 = vmatprep.subr.bf16.mxu1 %v792_v13 }
  0x14   :  { %670 = vmatprep.subr.bf16.mxu0 %v777_v6 }
  0x16   :  { %701 = vmatpush3.bf16.msra.mxu1 %v792_v13 }
  0x17   :  { %671 = vmatpush3.bf16.msra.mxu0 %v777_v6  ;;  %702 = vmatprep.subr.bf16.mxu1 %v793_v16 }
  0x18   :  { %672 = vmatprep.subr.bf16.mxu0 %v778_v9 }
  0x1a   :  { %703 = vmatpush3.bf16.msra.mxu1 %v793_v16 }
  0x1b   :  { %673 = vmatpush3.bf16.msra.mxu0 %v778_v9  ;;  %704 = vmatprep.subr.bf16.mxu1 %v794_v22 }
  0x1c   :  { %674 = vmatprep.subr.bf16.mxu0 %v779_v11 }
  0x1e   :  { %705 = vmatpush3.bf16.msra.mxu1 %v794_v22 }
  0x1f   :  { %675 = vmatpush3.bf16.msra.mxu0 %v779_v11  ;;  %706 = vmatprep.subr.bf16.mxu1 %v795_v23 }
  0x22   :  { %677 = vmatmul.mubr.bf16.vlgmr.msra.gmra.mrb[0].mxu0 %v871_v14  ;;  %707 = vmatpush3.bf16.msra.mxu1 %v795_v23 }
  0x23   :  { %680 = vmatprep.mubr.bf16.mxu0 %v876_v15 }
  0x2a   :  { %681 = vmatmul.mubr.bf16.gmra.mrb[4].mxu0 %v886_v17 }
  0x2b   :  { %684 = vmatprep.mubr.bf16.mxu0 %v891_v18 }
  0x32   :  { %685 = vmatmul.mubr.bf16.gmra.mrb[8].mxu0 %v898_v19 }
  0x33   :  { %688 = vmatprep.mubr.bf16.mxu0 %v903_v20 }
  0x3a   :  { %689 = vmatmul.mubr.bf16.gmra.mrb[12].mxu0 %v910_v21 }
  0x3b   :  { %740 = vmatprep.mubr.bf16.mxu0 %v780_v4 }
  0xf5   :  { %v678_v25 = vpop.f32.mrb[0].mxu0 }
  0xf6   :  { %v199_v26 = vadd.f32 %v678_v25, %v586_v24  ;;  %v190_v27 = vpop.f32.mrb[1].mxu0 }
  0xf7   :  { %v191_v28 = vadd.f32 %v586_v24, %v190_v27  ;;  %v679_v29 = vpop.f32.mrb[2].mxu0 }
  0xf8   :  { %v202_v30 = vadd.f32 %v679_v29, %v586_v24  ;;  %v193_v31 = vpop.f32.mrb[3].mxu0  ;;  %v255_v33 = vmax.f32 %v199_v26, 0.0 }
  0xf9   :  { %v194_v32 = vadd.f32 %v586_v24, %v193_v31  ;;  %v253_v35 = vmax.f32 %v191_v28, 0.0 }
  0xfa   :  { %v256_v34 = vmax.f32 %v202_v30, 0.0 }
  0xfb   :  { %v254_v36 = vmax.f32 %v194_v32, 0.0 }
  0xfc   :  { %v270_v37 = vpack.c.bf16 %v256_v34, %v255_v33 }
  0xfd   :  { %v682_v38 = vpop.f32.mrb[4].mxu0  ;;  %v269_v39 = vpack.c.bf16 %v254_v36, %v253_v35 }
  0xfe   :  { %v215_v40 = vadd.f32 %v682_v38, %v586_v24  ;;  %v206_v41 = vpop.f32.mrb[5].mxu0 }
  0xff   :  { %v207_v42 = vadd.f32 %v586_v24, %v206_v41  ;;  %v683_v43 = vpop.f32.mrb[6].mxu0  ;;  %708 = vmatprep.mubr.bf16.mxu1 %v269_v39 }
 0x100   :  { %v218_v44 = vadd.f32 %v683_v43, %v586_v24  ;;  %v209_v45 = vpop.f32.mrb[7].mxu0  ;;  %709 = vmatmul.mubr.bf16.vlgmr.msra.gmra.mrb[0].mxu1 %v270_v37  ;;  %v259_v47 = vmax.f32 %v215_v40, 0.0 }
 0x101   :  { %v210_v46 = vadd.f32 %v586_v24, %v209_v45  ;;  %v257_v49 = vmax.f32 %v207_v42, 0.0 }
 0x102   :  { %v260_v48 = vmax.f32 %v218_v44, 0.0 }
 0x103   :  { %v258_v50 = vmax.f32 %v210_v46, 0.0 }
 0x104   :  { %v272_v51 = vpack.c.bf16 %v260_v48, %v259_v47  ;;  %v611_v47 = vld [vmem:[%s984_s4] ss:$0 sm:$0xff] }
 0x105   :  { %v271_v52 = vpack.c.bf16 %v258_v50, %v257_v49  ;;  %v686_v53 = vpop.f32.mrb[8].mxu0 }
 0x106   :  { %v231_v54 = vadd.f32 %v686_v53, %v586_v24  ;;  %v222_v55 = vpop.f32.mrb[9].mxu0 }
 0x107   :  { %v223_v56 = vadd.f32 %v586_v24, %v222_v55  ;;  %v687_v57 = vpop.f32.mrb[10].mxu0  ;;  %712 = vmatprep.mubr.bf16.mxu1 %v271_v52 }
 0x108   :  { %v234_v58 = vadd.f32 %v687_v57, %v586_v24  ;;  %v225_v59 = vpop.f32.mrb[11].mxu0  ;;  %713 = vmatmul.mubr.bf16.gmra.mrb[4].mxu1 %v272_v51  ;;  %v263_v61 = vmax.f32 %v231_v54, 0.0 }
 0x109   :  { %v226_v60 = vadd.f32 %v586_v24, %v225_v59  ;;  %v261_v63 = vmax.f32 %v223_v56, 0.0 }
 0x10a   :  { %v264_v62 = vmax.f32 %v234_v58, 0.0 }
 0x10b   :  { %v262_v0 = vmax.f32 %v226_v60, 0.0 }
 0x10c   :  { %v274_v1 = vpack.c.bf16 %v264_v62, %v263_v61 }
 0x10d   :  { %v273_v2 = vpack.c.bf16 %v262_v0, %v261_v63  ;;  %v690_v3 = vpop.f32.mrb[12].mxu0 }
 0x10e   :  { %v247_v4 = vadd.f32 %v690_v3, %v586_v24  ;;  %v238_v5 = vpop.f32.mrb[13].mxu0 }
 0x10f   :  { %v239_v6 = vadd.f32 %v586_v24, %v238_v5  ;;  %v691_v7 = vpop.f32.mrb[14].mxu0  ;;  %716 = vmatprep.mubr.bf16.mxu1 %v273_v2 }
 0x110   :  { %v250_v8 = vadd.f32 %v691_v7, %v586_v24  ;;  %v241_v9 = vpop.f32.mrb[15].mxu0  ;;  %717 = vmatmul.mubr.bf16.gmra.mrb[8].mxu1 %v274_v1  ;;  %v267_v11 = vmax.f32 %v247_v4, 0.0 }
 0x111   :  { %v242_v10 = vadd.f32 %v586_v24, %v241_v9  ;;  %v265_v13 = vmax.f32 %v239_v6, 0.0 }
 0x112   :  { %v268_v12 = vmax.f32 %v250_v8, 0.0 }
 0x113   :  { %v266_v16 = vmax.f32 %v242_v10, 0.0 }
 0x114   :  { %v276_v22 = vpack.c.bf16 %v268_v12, %v267_v11 }
 0x115   :  { %v275_v23 = vpack.c.bf16 %v266_v16, %v265_v13 }
 0x117   :  { %720 = vmatprep.mubr.bf16.mxu1 %v275_v23 }
 0x118   :  { %721 = vmatmul.mubr.bf16.gmra.mrb[12].mxu1 %v276_v22 }
 0x119   :  { %748 = vmatprep.mubr.bf16.mxu1 %v891_v18 }
 0x1d3   :  { %v710_v25 = vpop.f32.mrb[0].mxu1 }
 0x1d4   :  { %v375_v26 = vpop.f32.mrb[1].mxu1 }
 0x1d5   :  { %v711_v27 = vpop.f32.mrb[2].mxu1 }
 0x1d6   :  { %v439_v28 = vpack.c.bf16 %v711_v27, %v710_v25  ;;  %v378_v29 = vpop.f32.mrb[3].mxu1 }
 0x1d7   :  { %v438_v30 = vpack.c.bf16 %v378_v29, %v375_v26 }
 0x1d9   :  { %724 = vmatprep.subr.bf16.mxu0 %v438_v30  ;;  %756 = vmatprep.subr.bf16.mxu1 %v438_v30 }
 0x1da   :  { %725 = vmatpush3.bf16.msra.mxu0 %v438_v30  ;;  %764 = vmatpush3.bf16.msra.mxu1 %v438_v30 }
 0x1db   :  { %v714_v24 = vpop.f32.mrb[4].mxu1  ;;  %726 = vmatprep.subr.bf16.mxu0 %v439_v28  ;;  %757 = vmatprep.subr.bf16.mxu1 %v439_v28 }
 0x1dc   :  { %v391_v31 = vpop.f32.mrb[5].mxu1 }
 0x1dd   :  { %v715_v32 = vpop.f32.mrb[6].mxu1 }
 0x1de   :  { %v441_v33 = vpack.c.bf16 %v715_v32, %v714_v24  ;;  %v394_v34 = vpop.f32.mrb[7].mxu1  ;;  %727 = vmatpush3.bf16.msra.mxu0 %v439_v28  ;;  %765 = vmatpush3.bf16.msra.mxu1 %v439_v28 }
 0x1df   :  { %v440_v18 = vpack.c.bf16 %v394_v34, %v391_v31 }
 0x1e1   :  { %728 = vmatprep.subr.bf16.mxu0 %v440_v18  ;;  %758 = vmatprep.subr.bf16.mxu1 %v440_v18 }
 0x1e2   :  { %729 = vmatpush3.bf16.msra.mxu0 %v440_v18  ;;  %766 = vmatpush3.bf16.msra.mxu1 %v440_v18 }
 0x1e3   :  { %v718_v35 = vpop.f32.mrb[8].mxu1  ;;  %730 = vmatprep.subr.bf16.mxu0 %v441_v33  ;;  %759 = vmatprep.subr.bf16.mxu1 %v441_v33 }
 0x1e4   :  { %v407_v36 = vpop.f32.mrb[9].mxu1 }
 0x1e5   :  { %v719_v37 = vpop.f32.mrb[10].mxu1 }
 0x1e6   :  { %v443_v38 = vpack.c.bf16 %v719_v37, %v718_v35  ;;  %v410_v39 = vpop.f32.mrb[11].mxu1  ;;  %731 = vmatpush3.bf16.msra.mxu0 %v441_v33  ;;  %767 = vmatpush3.bf16.msra.mxu1 %v441_v33 }
 0x1e7   :  { %v442_v40 = vpack.c.bf16 %v410_v39, %v407_v36 }
 0x1e9   :  { %732 = vmatprep.subr.bf16.mxu0 %v442_v40  ;;  %760 = vmatprep.subr.bf16.mxu1 %v442_v40 }
 0x1ea   :  { %733 = vmatpush3.bf16.msra.mxu0 %v442_v40  ;;  %768 = vmatpush3.bf16.msra.mxu1 %v442_v40 }
 0x1eb   :  { %v722_v41 = vpop.f32.mrb[12].mxu1  ;;  %734 = vmatprep.subr.bf16.mxu0 %v443_v38  ;;  %761 = vmatprep.subr.bf16.mxu1 %v443_v38 }
 0x1ec   :  { %v423_v42 = vpop.f32.mrb[13].mxu1 }
 0x1ed   :  { %v723_v43 = vpop.f32.mrb[14].mxu1 }
 0x1ee   :  { %v445_v44 = vpack.c.bf16 %v723_v43, %v722_v41  ;;  %v426_v45 = vpop.f32.mrb[15].mxu1  ;;  %735 = vmatpush3.bf16.msra.mxu0 %v443_v38  ;;  %769 = vmatpush3.bf16.msra.mxu1 %v443_v38 }
 0x1ef   :  { %v444_v46 = vpack.c.bf16 %v426_v45, %v423_v42 }
 0x1f1   :  { %736 = vmatprep.subr.bf16.mxu0 %v444_v46  ;;  %762 = vmatprep.subr.bf16.mxu1 %v444_v46 }
 0x1f2   :  { %737 = vmatpush3.bf16.msra.mxu0 %v444_v46  ;;  %770 = vmatpush3.bf16.msra.mxu1 %v444_v46 }
 0x1f3   :  { %738 = vmatprep.subr.bf16.mxu0 %v445_v44  ;;  %763 = vmatprep.subr.bf16.mxu1 %v445_v44 }
 0x1f6   :  { %739 = vmatpush3.bf16.msra.mxu0 %v445_v44  ;;  %771 = vmatpush3.bf16.msra.mxu1 %v445_v44 }
 0x1f9   :  { %741 = vmatmul.mubr.bf16.vlgmr.msra.gmra.mrb[16].mxu0 %v871_v14  ;;  %749 = vmatmul.mubr.bf16.vlgmr.msra.gmra.mrb[16].mxu1 %v898_v19 }
 0x1fa   :  { %744 = vmatprep.mubr.bf16.mxu0 %v876_v15  ;;  %752 = vmatprep.mubr.bf16.mxu1 %v903_v20 }
 0x201   :  { %745 = vmatmul.mubr.bf16.gmra.mrb[20].mxu0 %v886_v17  ;;  %753 = vmatmul.mubr.bf16.gmra.mrb[20].mxu1 %v910_v21 }
 0x2cc   :  { %v742_v48 = vpop.f32.mrb[16].mxu0  ;;  %v750_v49 = vpop.f32.mrb[16].mxu1 }
 0x2cd   :  { %v496_v50 = vadd.f32 %v742_v48, %v611_v47  ;;  %v528_v51 = vadd.f32 %v750_v49, %v611_v47  ;;  %v487_v52 = vpop.f32.mrb[17].mxu0  ;;  %v519_v14 = vpop.f32.mrb[17].mxu1 }
 0x2ce   :  { %v488_v53 = vadd.f32 %v611_v47, %v487_v52  ;;  %v520_v19 = vadd.f32 %v611_v47, %v519_v14  ;;  %v743_v54 = vpop.f32.mrb[18].mxu0  ;;  %v751_v15 = vpop.f32.mrb[18].mxu1 }
 0x2cf   :  { %v552_v55 = vmax.f32 %v496_v50, 0.0  ;;  %v560_v20 = vmax.f32 %v528_v51, 0.0  ;;  %v499_v56 = vadd.f32 %v743_v54, %v611_v47  ;;  %v531_v17 = vadd.f32 %v751_v15, %v611_v47  ;;  %v490_v57 = vpop.f32.mrb[19].mxu0  ;;  %v522_v21 = vpop.f32.mrb[19].mxu1 }
 0x2d0   :  { %v550_v58 = vmax.f32 %v488_v53, 0.0  ;;  %v558_v59 = vmax.f32 %v520_v19, 0.0  ;;  %v491_v60 = vadd.f32 %v611_v47, %v490_v57  ;;  %v523_v61 = vadd.f32 %v611_v47, %v522_v21 }
 0x2d1   :  { %568 = vst [vmem:[%s985_s5 + $0x10] sm:$0xff] %v552_v55  ;;  %576 = vst [vmem:[%s985_s5 + $0x50] sm:$0xff] %v560_v20  ;;  %v553_v62 = vmax.f32 %v499_v56, 0.0  ;;  %v561_v63 = vmax.f32 %v531_v17, 0.0 }
 0x2d2   :  { %566 = vst [vmem:[%s985_s5] sm:$0xff] %v550_v58  ;;  %574 = vst [vmem:[%s985_s5 + $0x40] sm:$0xff] %v558_v59  ;;  %v551_v0 = vmax.f32 %v491_v60, 0.0  ;;  %v559_v1 = vmax.f32 %v523_v61, 0.0 }
 0x2d3   :  { %569 = vst [vmem:[%s985_s5 + $0x18] sm:$0xff] %v553_v62  ;;  %577 = vst [vmem:[%s985_s5 + $0x58] sm:$0xff] %v561_v63 }
 0x2d4   :  { %567 = vst [vmem:[%s985_s5 + $0x8] sm:$0xff] %v551_v0  ;;  %575 = vst [vmem:[%s985_s5 + $0x48] sm:$0xff] %v559_v1  ;;  %v746_v2 = vpop.f32.mrb[20].mxu0  ;;  %v754_v3 = vpop.f32.mrb[20].mxu1 }
 0x2d5   :  { %v512_v4 = vadd.f32 %v746_v2, %v611_v47  ;;  %v544_v5 = vadd.f32 %v754_v3, %v611_v47  ;;  %v503_v6 = vpop.f32.mrb[21].mxu0  ;;  %v535_v7 = vpop.f32.mrb[21].mxu1 }
 0x2d6   :  { %v504_v8 = vadd.f32 %v611_v47, %v503_v6  ;;  %v536_v9 = vadd.f32 %v611_v47, %v535_v7  ;;  %v747_v10 = vpop.f32.mrb[22].mxu0  ;;  %v755_v11 = vpop.f32.mrb[22].mxu1 }
 0x2d7   :  { %v556_v12 = vmax.f32 %v512_v4, 0.0  ;;  %v564_v13 = vmax.f32 %v544_v5, 0.0  ;;  %v515_v16 = vadd.f32 %v747_v10, %v611_v47  ;;  %v547_v22 = vadd.f32 %v755_v11, %v611_v47  ;;  %v506_v23 = vpop.f32.mrb[23].mxu0  ;;  %v538_v25 = vpop.f32.mrb[23].mxu1 }
 0x2d8   :  { %v554_v26 = vmax.f32 %v504_v8, 0.0  ;;  %v562_v27 = vmax.f32 %v536_v9, 0.0  ;;  %v507_v28 = vadd.f32 %v611_v47, %v506_v23  ;;  %v539_v29 = vadd.f32 %v611_v47, %v538_v25 }
 0x2d9   :  { %572 = vst [vmem:[%s985_s5 + $0x30] sm:$0xff] %v556_v12  ;;  %580 = vst [vmem:[%s985_s5 + $0x70] sm:$0xff] %v564_v13  ;;  %v557_v30 = vmax.f32 %v515_v16, 0.0  ;;  %v565_v24 = vmax.f32 %v547_v22, 0.0 }
 0x2da   :  { %570 = vst [vmem:[%s985_s5 + $0x20] sm:$0xff] %v554_v26  ;;  %578 = vst [vmem:[%s985_s5 + $0x60] sm:$0xff] %v562_v27  ;;  %v555_v31 = vmax.f32 %v507_v28, 0.0  ;;  %v563_v32 = vmax.f32 %v539_v29, 0.0 }
 0x2db   :  { %573 = vst [vmem:[%s985_s5 + $0x38] sm:$0xff] %v557_v30  ;;  %581 = vst [vmem:[%s985_s5 + $0x78] sm:$0xff] %v565_v24 }
 0x2dc   :  { %571 = vst [vmem:[%s985_s5 + $0x28] sm:$0xff] %v555_v31  ;;  %579 = vst [vmem:[%s985_s5 + $0x68] sm:$0xff] %v563_v32 }

</bundles_post_ra>
